<compile_context>
chip_gen: v5e
topology: v5e:2x2
jax: 0.10.0
libtpu: 0.0.40
codegen_flags: <defaults>
</compile_context>

<pallas_src>
import functools

import jax
import jax.numpy as jnp
import numpy as np
from jax.experimental import pallas as pl
from jax.experimental.pallas import tpu as pltpu


def _round_width(width, multiplier, min_width=8, divisor=8):
    if not multiplier:
        return width
    width *= multiplier
    min_width = min_width or divisor
    width_out = max(min_width, int(width + divisor / 2) // divisor * divisor)
    if width_out < 0.9 * width:
        width_out += divisor
    return int(width_out)


# ---------------------------------------------------------------------------
# VMEM / block-size budgeting
# ---------------------------------------------------------------------------

_TARGET_BLOCK_BYTES = 4 << 20   # 2-4 MiB x-blocks amortize the ~0.35 us/step cost
_MIN_STEPS = 16                 # keep the pipelines (and both v7x TCs) busy
_AI_CAP = 32                    # cap pool/bcast matmul intensity (~t/2 flop/byte)


def _vmem_budget_bytes():
    """Chip-aware total-VMEM budget: 3/4 of physical, capped at 100 MiB.

    v7x: 64 MiB physical -> 48 MiB budget; v5e/v6e: 128 MiB -> 96 MiB.
    """
    phys = 64 << 20
    try:
        info = pltpu.get_tpu_info()
        phys = int(getattr(info, "vmem_capacity_bytes", phys)) or phys
    except Exception:
        pass
    return int(min(100 << 20, (phys * 3) // 4))


def _fc_bytes(C, Cfc):
    # fc weights + biases (f32), budgeted at worst-case double-buffering.
    return 2 * 4 * (Cfc * C + Cfc + C * Cfc + C)


def _matmul_need_bytes(C, t, HW, itemsize, fc_bytes):
    blk = C * t * HW * itemsize            # one x / out block
    inv = 2 * 2 * (t * HW) * t * 2         # pool + bcast, bf16, assume 2 buffers
    return 4 * blk + inv + fc_bytes + (2 << 20)


def _reduce_need_bytes(C, t, HW, itemsize, fc_bytes):
    return 4 * C * t * HW * itemsize + fc_bytes + (2 << 20)


def _shrink_for_steps(best, cands, N, T, min_steps):
    while N * (T // best) < min_steps:
        smaller = [t for t in cands if t < best]
        if not smaller:
            break
        best = max(smaller)
    return best


def _pick_t_matmul(N, C, T, HW, itemsize, fc_bytes, vmem_budget):
    """Frames/block for the lane-dense fused path; None if infeasible."""
    cands = [
        t for t in range(1, T + 1)
        if T % t == 0 and (t * HW) % 128 == 0 and t <= _AI_CAP
        and _matmul_need_bytes(C, t, HW, itemsize, fc_bytes) <= vmem_budget
    ]
    if not cands:
        return None
    fit = [t for t in cands if C * t * HW * itemsize <= _TARGET_BLOCK_BYTES]
    best = max(fit) if fit else min(cands)
    return _shrink_for_steps(best, cands, N, T, _MIN_STEPS)


def _pick_t_reduce(N, C, T, HW, itemsize, fc_bytes, vmem_budget):
    """Frames/block for the 4-D reduce/splat path; always returns a legal t."""
    cands = [t for t in range(1, T + 1) if T % t == 0 and (t % 8 == 0 or t == T)]
    fitting = [t for t in cands
               if _reduce_need_bytes(C, t, HW, itemsize, fc_bytes) <= vmem_budget]
    if not fitting:
        # TODO(synk): also block over channels if even one legal frame-slab
        # exceeds the VMEM budget (needs a two-stage C reduction for the FCs).
        fitting = [min(cands)]
    fit = [t for t in fitting if C * t * HW * itemsize <= _TARGET_BLOCK_BYTES]
    best = max(fit) if fit else min(fitting)
    return _shrink_for_steps(best, fitting, N, T, _MIN_STEPS)


@functools.lru_cache(maxsize=None)
def _pool_bcast(t_blk, HW):
    """0/1 frame-selector matrices in bf16 (exact; half the VMEM/DMA of f32)."""
    seg = np.arange(t_blk * HW, dtype=np.int32) // HW          # lane -> local frame
    frm = np.arange(t_blk, dtype=np.int32)
    sel = seg[:, None] == frm[None, :]                         # (t*HW, t) bool
    pool = jnp.asarray(sel, dtype=jnp.bfloat16)                # (t*HW, t)
    bcast = jnp.asarray(np.ascontiguousarray(sel.T), dtype=jnp.bfloat16)  # (t, t*HW)
    return pool, bcast


def _invariant_spec(block_shape, index_map):
    # Fetched once (constant index_map) -> a single VMEM buffer is enough; the
    # default double buffer would only waste VMEM (matters most on v7x's 64 MiB).
    try:
        return pl.BlockSpec(block_shape, index_map, pipeline_mode=pl.Buffered(1))
    except Exception:
        return pl.BlockSpec(block_shape, index_map)


# ---------------------------------------------------------------------------
# Kernels
# ---------------------------------------------------------------------------

def _cose_matmul_kernel(x_ref, pool_ref, w1_ref, b1_ref, w2_ref, b2_ref,
                        bcast_ref, o_ref, *, inv_hw):
    # x_ref: (C, t*HW) - channels on sublanes, fused (frame, spatial) on lanes.
    xf = x_ref[...].astype(jnp.float32)

    # Squeeze: per-frame spatial sum as a matmul on the otherwise-idle MXU,
    # scaled by 1/HW afterwards (pool entries are exactly 1.0 in bf16).
    m = jnp.dot(xf, pool_ref[...].astype(jnp.float32),
                preferred_element_type=jnp.float32) * inv_hw            # (C, t)

    # fc1 + ReLU, fc2 + sigmoid (1x1 convs == channel matmuls, frames on lanes).
    h = jnp.dot(w1_ref[...], m, preferred_element_type=jnp.float32) + b1_ref[...]
    h = jnp.maximum(h, 0.0)                                             # (Cfc, t)
    s = jax.nn.sigmoid(
        jnp.dot(w2_ref[...], h, preferred_element_type=jnp.float32) + b2_ref[...])

    # Excite: broadcast the gate over H*W via a tiny 0/1 matmul, then multiply.
    scale = jnp.dot(s, bcast_ref[...].astype(jnp.float32),
                    preferred_element_type=jnp.float32)                 # (C, t*HW)
    if o_ref.dtype != jnp.float32:
        scale = scale.astype(o_ref.dtype)
    o_ref[...] = x_ref[...] * scale


def _cose_reduce_kernel(x_ref, w1_ref, b1_ref, w2_ref, b2_ref, o_ref):
    # x_ref: (C, t, HW). Squeeze = XLU cross-lane mean; excite = VPU lane splat.
    x = x_ref[...]
    m = jnp.mean(x.astype(jnp.float32), axis=-1)                        # (C, t)
    h = jnp.dot(w1_ref[...], m, preferred_element_type=jnp.float32) + b1_ref[...]
    h = jnp.maximum(h, 0.0)                                             # (Cfc, t)
    s = jax.nn.sigmoid(
        jnp.dot(w2_ref[...], h, preferred_element_type=jnp.float32) + b2_ref[...])
    if o_ref.dtype != jnp.float32:
        s = s.astype(o_ref.dtype)
    o_ref[...] = x * s[:, :, None]


# ---------------------------------------------------------------------------
# Wrapper
# ---------------------------------------------------------------------------

def co_se_alt_forward(x, w1, b1, w2, b2):
    """CoSeAlt.forward with scope='frame'.

    x: (N, C, T, H, W).  w1: (Cfc, C), b1: (Cfc,)  [fc1 = Conv3d(C, Cfc, 1)]
                         w2: (C, Cfc), b2: (C,)    [fc2 = Conv3d(Cfc, C, 1)]
    """
    N, C, T, H, W = x.shape
    Cfc = w1.shape[0]
    HW = H * W
    itemsize = jnp.dtype(x.dtype).itemsize

    vmem_budget = _vmem_budget_bytes()
    fc_bytes = _fc_bytes(C, Cfc)

    b1k = b1.reshape(Cfc, 1)
    b2k = b2.reshape(C, 1)

    t_blk = None
    if HW % 128 != 0:
        # Lane-dense fused path (keeps stores unmasked when HW itself isn't
        # a multiple of 128). Returns None if no divisor fits the VMEM/AI budget.
        t_blk = _pick_t_matmul(N, C, T, HW, itemsize, fc_bytes, vmem_budget)

    if t_blk is not None:
        thw = t_blk * HW
        xk = x.reshape(N, C, T * HW)                 # free view of NCTHW
        pool, bcast = _pool_bcast(t_blk, HW)
        need = _matmul_need_bytes(C, t_blk, HW, itemsize, fc_bytes)
        cost = pl.CostEstimate(
            flops=int(4 * N * C * T * HW * t_blk + 4 * N * T * C * Cfc
                      + N * C * T * HW),
            transcendentals=int(N * C * T),
            bytes_accessed=int(2 * N * C * T * HW * itemsize),
        )
        kernel = functools.partial(_cose_matmul_kernel, inv_hw=float(1.0 / HW))
        out = pl.pallas_call(
            kernel,
            out_shape=jax.ShapeDtypeStruct((N, C, T * HW), x.dtype),
            grid_spec=pltpu.PrefetchScalarGridSpec(
                num_scalar_prefetch=0,
                grid=(N, T // t_blk),
                in_specs=[
                    pl.BlockSpec((None, C, thw), lambda n, j: (n, 0, j)),
                    _invariant_spec((thw, t_blk), lambda n, j: (0, 0)),
                    _invariant_spec((Cfc, C), lambda n, j: (0, 0)),
                    _invariant_spec((Cfc, 1), lambda n, j: (0, 0)),
                    _invariant_spec((C, Cfc), lambda n, j: (0, 0)),
                    _invariant_spec((C, 1), lambda n, j: (0, 0)),
                    _invariant_spec((t_blk, thw), lambda n, j: (0, 0)),
                ],
                out_specs=pl.BlockSpec((None, C, thw), lambda n, j: (n, 0, j)),
            ),
            compiler_params=pltpu.CompilerParams(
                dimension_semantics=("parallel", "parallel"),
                vmem_limit_bytes=int(min(vmem_budget, max(need, 16 << 20))),
            ),
            cost_estimate=cost,
        )(xk, pool, w1, b1k, w2, b2k, bcast)
        return out.reshape(N, C, T, H, W)

    # 4-D reduce/splat path: always legal (last block dim == full HW); lane-dense
    # and matmul-free when HW % 128 == 0, and the safe fallback otherwise
    # (masked stores are far cheaper than huge pool/bcast VMEM blowups).
    t_blk = _pick_t_reduce(N, C, T, HW, itemsize, fc_bytes, vmem_budget)
    xk = x.reshape(N, C, T, HW)
    need = _reduce_need_bytes(C, t_blk, HW, itemsize, fc_bytes)
    cost = pl.CostEstimate(
        flops=int(2 * N * C * T * HW + 4 * N * T * C * Cfc),
        transcendentals=int(N * C * T),
        bytes_accessed=int(2 * N * C * T * HW * itemsize),
    )
    out = pl.pallas_call(
        _cose_reduce_kernel,
        out_shape=jax.ShapeDtypeStruct((N, C, T, HW), x.dtype),
        grid_spec=pltpu.PrefetchScalarGridSpec(
            num_scalar_prefetch=0,
            grid=(N, T // t_blk),
            in_specs=[
                pl.BlockSpec((None, C, t_blk, HW), lambda n, j: (n, 0, j, 0)),
                _invariant_spec((Cfc, C), lambda n, j: (0, 0)),
                _invariant_spec((Cfc, 1), lambda n, j: (0, 0)),
                _invariant_spec((C, Cfc), lambda n, j: (0, 0)),
                _invariant_spec((C, 1), lambda n, j: (0, 0)),
            ],
            out_specs=pl.BlockSpec((None, C, t_blk, HW), lambda n, j: (n, 0, j, 0)),
        ),
        compiler_params=pltpu.CompilerParams(
            dimension_semantics=("parallel", "parallel"),
            vmem_limit_bytes=int(min(vmem_budget, max(need, 16 << 20))),
        ),
        cost_estimate=cost,
    )(xk, w1, b1k, w2, b2k)
    return out.reshape(N, C, T, H, W)


def _reference(x, w1, b1, w2, b2):
    # Pure-JAX reference of CoSeAlt.forward with scope='frame'.
    m = jnp.mean(x, axis=(3, 4))                                # (N, C, T)
    h = jnp.einsum("nct,fc->nft", m, w1) + b1[None, :, None]    # (N, Cfc, T)
    h = jnp.maximum(h, 0.0)
    s = jnp.einsum("nft,cf->nct", h, w2) + b2[None, :, None]    # (N, C, T)
    s = jax.nn.sigmoid(s)
    return x * s[:, :, :, None, None]


if __name__ == "__main__":
    # TODO(synk): only forward() (scope='frame') is implemented; the stateful
    # forward_step/clean_state streaming API (scope='clip') is not.
    window_size = 4
    dim_in = 16
    ratio = 0.25
    dim_fc = _round_width(dim_in, ratio)          # -> 8

    key = jax.random.PRNGKey(0)
    kx1, k1, k2, k3, k4, kx2 = jax.random.split(key, 6)

    w1 = jax.random.normal(k1, (dim_fc, dim_in), dtype=jnp.float32) * 0.1
    b1 = jax.random.normal(k2, (dim_fc,), dtype=jnp.float32) * 0.1
    w2 = jax.random.normal(k3, (dim_in, dim_fc), dtype=jnp.float32) * 0.1
    b2 = jax.random.normal(k4, (dim_in,), dtype=jnp.float32) * 0.1

    # Case 1: HW = 64 (not 128-aligned) -> lane-dense fused path (pool/bcast matmuls).
    x1 = jax.random.normal(kx1, (2, dim_in, window_size, 8, 8), dtype=jnp.float32)
    out1 = jax.block_until_ready(co_se_alt_forward(x1, w1, b1, w2, b2))
    ref1 = jax.block_until_ready(_reference(x1, w1, b1, w2, b2))
    assert out1.shape == x1.shape and out1.dtype == x1.dtype
    assert jnp.allclose(out1, ref1, atol=1e-5, rtol=1e-5), "mismatch (fused path)"

    # Case 2: HW = 128 (128-aligned) -> 4-D reduce/splat fast path (no pool/bcast).
    x2 = jax.random.normal(kx2, (2, dim_in, window_size, 16, 8), dtype=jnp.float32)
    out2 = jax.block_until_ready(co_se_alt_forward(x2, w1, b1, w2, b2))
    ref2 = jax.block_until_ready(_reference(x2, w1, b1, w2, b2))
    assert out2.shape == x2.shape and out2.dtype == x2.dtype
    assert jnp.allclose(out2, ref2, atol=1e-5, rtol=1e-5), "mismatch (reduce path)"

    print("KERNEL_OK")
</pallas_src>

<mosaic_0001>
module attributes {stable_mosaic.version = 11 : i64} {
  func.func @_cose_matmul_kernel(%arg0: i32, %arg1: i32, %arg2: memref<1x16x128xf32, #tpu.memory_space<vmem>>, %arg3: memref<128x2xbf16, #tpu.memory_space<vmem>>, %arg4: memref<8x16xf32, #tpu.memory_space<vmem>>, %arg5: memref<8x1xf32, #tpu.memory_space<vmem>>, %arg6: memref<16x8xf32, #tpu.memory_space<vmem>>, %arg7: memref<16x1xf32, #tpu.memory_space<vmem>>, %arg8: memref<2x128xbf16, #tpu.memory_space<vmem>>, %arg9: memref<1x16x128xf32, #tpu.memory_space<vmem>>) attributes {dimension_semantics = [#tpu.dimension_semantics<parallel>, #tpu.dimension_semantics<parallel>], iteration_bounds = array<i64: 2, 2>, scalar_prefetch = 0 : i64, scratch_operands = 0 : i64, tpu.core_type = #tpu.core_type<tc>, window_params = [{transform_indices = @transform_0, window_bounds = array<i64: 1, 16, 128>}, {pipeline_mode = #tpu.pipeline_mode<synchronous>, transform_indices = @transform_1, window_bounds = array<i64: 128, 2>}, {pipeline_mode = #tpu.pipeline_mode<synchronous>, transform_indices = @transform_2, window_bounds = array<i64: 8, 16>}, {pipeline_mode = #tpu.pipeline_mode<synchronous>, transform_indices = @transform_3, window_bounds = array<i64: 8, 1>}, {pipeline_mode = #tpu.pipeline_mode<synchronous>, transform_indices = @transform_4, window_bounds = array<i64: 16, 8>}, {pipeline_mode = #tpu.pipeline_mode<synchronous>, transform_indices = @transform_5, window_bounds = array<i64: 16, 1>}, {pipeline_mode = #tpu.pipeline_mode<synchronous>, transform_indices = @transform_6, window_bounds = array<i64: 2, 128>}, {transform_indices = @transform_7, window_bounds = array<i64: 1, 16, 128>}]} {
    %c0 = arith.constant 0 : index
    %c0_0 = arith.constant 0 : index
    %c0_1 = arith.constant 0 : index
    %0 = vector.load %arg2[%c0, %c0_0, %c0_1] : memref<1x16x128xf32, #tpu.memory_space<vmem>>, vector<1x16x128xf32>
    %1 = vector.shape_cast %0 : vector<1x16x128xf32> to vector<16x128xf32>
    %c0_2 = arith.constant 0 : index
    %c0_3 = arith.constant 0 : index
    %2 = vector.load %arg3[%c0_2, %c0_3] : memref<128x2xbf16, #tpu.memory_space<vmem>>, vector<128x2xbf16>
    %3 = arith.extf %2 : vector<128x2xbf16> to vector<128x2xf32>
    %cst = arith.constant dense<0.000000e+00> : vector<16x2xf32>
    %4 = tpu.matmul %1, %3, %cst {dimension_numbers = #tpu.dot_dimension_numbers<[1], [0], [0], [1], [0, 0, 1, 1], [], []>} : vector<16x128xf32>, vector<128x2xf32>, vector<16x2xf32> -> vector<16x2xf32>
    %cst_4 = arith.constant 1.562500e-02 : f32
    %5 = vector.broadcast %cst_4 : f32 to vector<16x2xf32>
    %6 = arith.mulf %4, %5 : vector<16x2xf32>
    %c0_5 = arith.constant 0 : index
    %c0_6 = arith.constant 0 : index
    %7 = vector.load %arg4[%c0_5, %c0_6] : memref<8x16xf32, #tpu.memory_space<vmem>>, vector<8x16xf32>
    %cst_7 = arith.constant dense<0.000000e+00> : vector<8x2xf32>
    %8 = tpu.matmul %7, %6, %cst_7 {dimension_numbers = #tpu.dot_dimension_numbers<[1], [0], [0], [1], [0, 0, 1, 1], [], []>} : vector<8x16xf32>, vector<16x2xf32>, vector<8x2xf32> -> vector<8x2xf32>
    %c0_8 = arith.constant 0 : index
    %c0_9 = arith.constant 0 : index
    %9 = vector.load %arg5[%c0_8, %c0_9] : memref<8x1xf32, #tpu.memory_space<vmem>>, vector<8x1xf32>
    %10 = vector.broadcast %9 : vector<8x1xf32> to vector<8x2xf32>
    %11 = arith.addf %8, %10 : vector<8x2xf32>
    %cst_10 = arith.constant 0.000000e+00 : f32
    %12 = vector.broadcast %cst_10 : f32 to vector<8x2xf32>
    %13 = arith.maximumf %11, %12 : vector<8x2xf32>
    %c0_11 = arith.constant 0 : index
    %c0_12 = arith.constant 0 : index
    %14 = vector.load %arg6[%c0_11, %c0_12] : memref<16x8xf32, #tpu.memory_space<vmem>>, vector<16x8xf32>
    %cst_13 = arith.constant dense<0.000000e+00> : vector<16x2xf32>
    %15 = tpu.matmul %14, %13, %cst_13 {dimension_numbers = #tpu.dot_dimension_numbers<[1], [0], [0], [1], [0, 0, 1, 1], [], []>} : vector<16x8xf32>, vector<8x2xf32>, vector<16x2xf32> -> vector<16x2xf32>
    %c0_14 = arith.constant 0 : index
    %c0_15 = arith.constant 0 : index
    %16 = vector.load %arg7[%c0_14, %c0_15] : memref<16x1xf32, #tpu.memory_space<vmem>>, vector<16x1xf32>
    %17 = vector.broadcast %16 : vector<16x1xf32> to vector<16x2xf32>
    %18 = arith.addf %15, %17 : vector<16x2xf32>
    %19 = arith.negf %18 : vector<16x2xf32>
    %20 = math.exp %19 : vector<16x2xf32>
    %cst_16 = arith.constant 1.000000e+00 : f32
    %21 = vector.broadcast %cst_16 : f32 to vector<16x2xf32>
    %22 = arith.addf %21, %20 : vector<16x2xf32>
    %23 = arith.divf %21, %22 : vector<16x2xf32>
    %c0_17 = arith.constant 0 : index
    %c0_18 = arith.constant 0 : index
    %24 = vector.load %arg8[%c0_17, %c0_18] : memref<2x128xbf16, #tpu.memory_space<vmem>>, vector<2x128xbf16>
    %25 = arith.extf %24 : vector<2x128xbf16> to vector<2x128xf32>
    %cst_19 = arith.constant dense<0.000000e+00> : vector<16x128xf32>
    %26 = tpu.matmul %23, %25, %cst_19 {dimension_numbers = #tpu.dot_dimension_numbers<[1], [0], [0], [1], [0, 0, 1, 1], [], []>} : vector<16x2xf32>, vector<2x128xf32>, vector<16x128xf32> -> vector<16x128xf32>
    %c0_20 = arith.constant 0 : index
    %c0_21 = arith.constant 0 : index
    %c0_22 = arith.constant 0 : index
    %27 = vector.load %arg2[%c0_20, %c0_21, %c0_22] : memref<1x16x128xf32, #tpu.memory_space<vmem>>, vector<1x16x128xf32>
    %28 = vector.shape_cast %27 : vector<1x16x128xf32> to vector<16x128xf32>
    %29 = arith.mulf %28, %26 : vector<16x128xf32>
    %c0_23 = arith.constant 0 : index
    %c0_24 = arith.constant 0 : index
    %c0_25 = arith.constant 0 : index
    %30 = vector.load %arg9[%c0_23, %c0_24, %c0_25] : memref<1x16x128xf32, #tpu.memory_space<vmem>>, vector<1x16x128xf32>
    %31 = vector.shape_cast %30 : vector<1x16x128xf32> to vector<16x128xf32>
    %32 = vector.shape_cast %29 : vector<16x128xf32> to vector<1x16x128xf32>
    tpu.vector_store %arg9[%c0_23, %c0_24, %c0_25], %32 {strides = array<i32>} : memref<1x16x128xf32, #tpu.memory_space<vmem>>, vector<1x16x128xf32>,
    return
  }
  func.func @transform_0(%arg0: i32, %arg1: i32) -> (i32, i32, i32) {
    %c0_i32 = arith.constant 0 : i32
    %c0_i32_0 = arith.constant 0 : i32
    return %arg0, %c0_i32, %arg1 : i32, i32, i32
  }
  func.func @transform_1(%arg0: i32, %arg1: i32) -> (i32, i32) {
    %c0_i32 = arith.constant 0 : i32
    %c0_i32_0 = arith.constant 0 : i32
    %c0_i32_1 = arith.constant 0 : i32
    return %c0_i32, %c0_i32_0 : i32, i32
  }
  func.func @transform_2(%arg0: i32, %arg1: i32) -> (i32, i32) {
    %c0_i32 = arith.constant 0 : i32
    %c0_i32_0 = arith.constant 0 : i32
    %c0_i32_1 = arith.constant 0 : i32
    return %c0_i32, %c0_i32_0 : i32, i32
  }
  func.func @transform_3(%arg0: i32, %arg1: i32) -> (i32, i32) {
    %c0_i32 = arith.constant 0 : i32
    %c0_i32_0 = arith.constant 0 : i32
    %c0_i32_1 = arith.constant 0 : i32
    return %c0_i32, %c0_i32_0 : i32, i32
  }
  func.func @transform_4(%arg0: i32, %arg1: i32) -> (i32, i32) {
    %c0_i32 = arith.constant 0 : i32
    %c0_i32_0 = arith.constant 0 : i32
    %c0_i32_1 = arith.constant 0 : i32
    return %c0_i32, %c0_i32_0 : i32, i32
  }
  func.func @transform_5(%arg0: i32, %arg1: i32) -> (i32, i32) {
    %c0_i32 = arith.constant 0 : i32
    %c0_i32_0 = arith.constant 0 : i32
    %c0_i32_1 = arith.constant 0 : i32
    return %c0_i32, %c0_i32_0 : i32, i32
  }
  func.func @transform_6(%arg0: i32, %arg1: i32) -> (i32, i32) {
    %c0_i32 = arith.constant 0 : i32
    %c0_i32_0 = arith.constant 0 : i32
    %c0_i32_1 = arith.constant 0 : i32
    return %c0_i32, %c0_i32_0 : i32, i32
  }
  func.func @transform_7(%arg0: i32, %arg1: i32) -> (i32, i32, i32) {
    %c0_i32 = arith.constant 0 : i32
    %c0_i32_0 = arith.constant 0 : i32
    return %arg0, %c0_i32, %arg1 : i32, i32, i32
  }
}

</mosaic_0001>

<bundles_post_ra>
// kernel: tpu_custom_call.1
= control target key start
LH: loop header
LB: loop body
LE: loop exit
PB: predicated region body
PF: predicated region fallthrough
CT: control target
= control target key end

     0   :  { %12 = vsyncpa [#allocation4], 0  ;;  %s1126_s0 = inlined_call_operand.vmem [shape: f32[2,16,256], index: 0, kind: input, shape index: {}]   ;;  %s1127_s1 = inlined_call_operand.vmem [shape: bf16[128,2], index: 1, kind: input, shape index: {}]   ;;  %s1128_s2 = inlined_call_operand.vmem [shape: f32[8,16], index: 2, kind: input, shape index: {}]   ;;  %s1129_s3 = inlined_call_operand.vmem [shape: f32[8,1], index: 3, kind: input, shape index: {}]   ;;  %s1130_s4 = inlined_call_operand.vmem [shape: f32[16,8], index: 4, kind: input, shape index: {}]   ;;  %s1131_s5 = inlined_call_operand.vmem [shape: f32[16,1], index: 5, kind: input, shape index: {}]   ;;  %s1132_s6 = inlined_call_operand.vmem [shape: bf16[2,128], index: 6, kind: input, shape index: {}]   ;;  %s1133_s7 = inlined_call_operand.hbm [shape: f32[2,16,256], index: 7, kind: output, shape index: {}]  }
   0x1   :  { %14 = vsyncpa [#allocation4 + $0x1], 0  ;;  %s934_s24 = smov 0   ;;  %s936_s25 = smov 0  }
   0x2   :  { %s938_s26 = smov 0   ;;  %s940_s27 = smov 0  }
   0x3   :  { %s942_s28 = smov 0   ;;  %s944_s29 = smov 0  }
   0x4   :  { %s946_s30 = smov 0   ;;  %s948_s8 = smov 0  }
   0x5 LB: > { %s647_s9 = sadd.s32 4294967295, %s888_s8   ;;  %s648_s10 = sadd.s32 4294967294, %s888_s8   ;;  %s888_s8 = sphi %s948_s8, %s20_s8   ;;  %s884_s30 = sphi %s946_s30, %s1146_s30   ;;  %s880_s29 = sphi %s944_s29, %s1145_s29   ;;  %s876_s28 = sphi %s942_s28, %s1144_s28   ;;  %s872_s27 = sphi %s940_s27, %s1143_s27   ;;  %s868_s26 = sphi %s938_s26, %s1142_s26   ;;  %s864_s25 = sphi %s936_s25, %s1141_s25   ;;  %s860_s24 = sphi %s934_s24, %s1140_s24  }
   0x6   : > { %s29_s11 = sadd.s32 1, %s880_s29  ;;  %s32_s12 = sadd.s32 1, %s884_s30 }
   0x7   : > { %p30_p0 = scmp.ge.s32.totalorder %s29_s11, 2  ;;  %p48_p1 = scmp.ne.s32.totalorder %s868_s26, %s864_s25 }
   0x8   : > { %p49_p2 = scmp.eq.s32.totalorder %s888_s8, 0  ;;  %p206_p5 = scmp.eq.s32.totalorder %s647_s9, 3 }
   0x9   : > { %s1148_s11 = smov (%p30_p0, %s29_s11), 0  ;;  %s1150_s12 = smov (!%p30_p0, %s32_s12), %s884_s30 }
   0xa   : > { %s37_s13 = ssub.s32 %s880_s29, %s1148_s11  ;;  %p986_p3 = por %p49_p2, %p48_p1 }
   0xb   : > { %p34_p4 = scmp.ge.s32.totalorder %s1150_s12, 2  ;;  %p211_p6 = scmp.ne.s32.totalorder %s864_s25, %s860_s24 }
   0xc   : > { %p212_p7 = scmp.eq.s32.totalorder %s648_s10, 3  ;;  %p994_p8 = por %p206_p5, %p48_p1 }
   0xd   : > { %s1152_s12 = smov (%p34_p4, %s1150_s12), 0  ;;  %s41_s19 = sadd.s32 1, %s868_s26 }
   0xe   : > { %1136 = sst [smem:[#allocation6_spill]] %s1152_s12  ;;  %p998_p9 = por %p212_p7, %p211_p6 }
   0xf   : > { %s36_s17 = ssub.s32 %s884_s30, %s1152_s12  ;;  %p650_p11 = scmp.ge.s32.totalorder %s888_s8, 4 }
  0x10   : > { %s38_s18 = sor.u32 %s37_s13, %s36_s17 }
  0x11   : > { %p39_p10 = scmp.eq.s32.totalorder %s38_s18, 0  ;;  %246 = sbr.rel (%p650_p11) target bundleno = 30 (0x1e), region = 40 }
  0x13   : > { %s1006_s20 = scalar_select %p39_p10, %s868_s26, %s41_s19  }
  0x16   : > { %249 = sbr.rel (!%p986_p3) target bundleno = 30 (0x1e), region = 44  ;;  %s251_s21 = sand.u32 (%p986_p3), 1, %s868_s26  }
  0x17   : > { %s652_s22 = sshll.u32 (%p986_p3), %s884_s30, 2  ;;  %s651_s23 = sshll.u32 (%p986_p3), %s251_s21, 4 }
  0x18   : > { %s255_s9 = sadd.s32 (%p986_p3), %s880_s29, %s652_s22  ;;  %s253_s18 = scalar_lea.vmem (%p986_p3), [#allocation2], %s651_s23 }
  0x19   : > { %s653_s10 = sshll.u32 (%p986_p3), %s255_s9, 3 }
  0x1a   : > { %s257_s17 = scalar_lea.vmem (%p986_p3), %s1126_s0, %s653_s10 }
  0x1b   : > { %v288_v0 = vld [vmem:[%s257_s17] sm:$0xff]  ;;  %v290_v1 = vld [vmem:[%s257_s17 + $0x10] sm:$0xff] }
  0x1c   : > { %289 = vst [vmem:[%s253_s18] sm:$0xff] %v288_v0 }
  0x1d   : > { %291 = vst [vmem:[%s253_s18 + $0x8] sm:$0xff] %v290_v1 }
  0x1e PF: > { %p654_p12 = scmp.ge.s32.totalorder %s888_s8, 1  ;;  %p296_p13 = scmp.lt.s32.totalorder %s888_s8, 5 }
  0x20   : > { %p297_p0 = pnand %p654_p12, %p296_p13 }
  0x21   : > { %s303_s12 = sand.u32 (!%p297_p0), 1, %s864_s25   ;;  %s666_s21 = sshll.u32 (!%p297_p0), %s876_s28, 2 }
  0x22   : > { %300 = sbr.rel (%p297_p0) target bundleno = 652 (0x28c), region = 82  ;;  %s1046_s9 = sshll.u32 (!%p297_p0), %s303_s12, 4 }
  0x23   : > { %s305_s10 = scalar_lea.vmem (!%p297_p0), [#allocation2], %s1046_s9  ;;  %s558_s22 = sadd.s32 (!%p297_p0), %s872_s27, %s666_s21 }
  0x24   : > { %s667_s23 = sshll.u32 (!%p297_p0), %s558_s22, 3  ;;  %s333_s18 = scalar_lea.vmem (!%p297_p0), [#allocation3], %s1046_s9 }
  0x25   : > { %s560_s17 = scalar_lea.hbm (!%p297_p0), %s1133_s7, %s667_s23  ;;  %s561_s14 = sshll.u32 (!%p297_p0), %s333_s18, 4  ;;  %s562_s14 = int_to_ptr.vmem [resolvable:$true] %s561_s14 }
  0x26   : > { %s563_s19 = sshll.u32 (!%p297_p0), %s560_s17, 4  ;;  %s548_s27 = scalar_lea.sflag (!%p297_p0), [#allocation4], %s303_s12  ;;  %s564_s19 = int_to_ptr.hbm [resolvable:$true] %s563_s19 }
  0x27   : > { %v708_v2 = vld [vmem:[%s1127_s1 + $0x38] sm:$0xff]   ;;  %v707_v3 = vld [vmem:[%s1127_s1 + $0x30] sm:$0xff]   ;;  %v706_v7 = vld [vmem:[%s1127_s1 + $0x28] sm:$0xff]   ;;  %v890_v29 = vmov 0   ;;  %vm400_vm0 = vcmask 130048   ;;  %vm439_vm1 = vcmask 64512  }
  0x28   : > { %v701_v4 = vunpack.c.h.bf16 %v708_v2  ;;  %v700_v5 = vunpack.c.l.bf16 %v708_v2  ;;  %v697_v6 = vunpack.c.h.bf16 %v707_v3  ;;  %v696_v8 = vunpack.c.l.bf16 %v707_v3  ;;  %v705_v10 = vld [vmem:[%s1127_s1 + $0x20] sm:$0xff]   ;;  %v704_v13 = vld [vmem:[%s1127_s1 + $0x18] sm:$0xff]   ;;  %v703_v16 = vld [vmem:[%s1127_s1 + $0x10] sm:$0xff]   ;;  %784 = vset.pattern.permute.xlu0 %v890_v29  ;;  %785 = vset.pattern.permute.xlu1 %v890_v29  ;;  %s808_s28 = sshra.s32 %s564_s19, 4  ;;  %s814_s23 = scalar_lea.hbm %s1133_s7, 64  ;;  %s809_s28 = int_to_ptr.hbm [resolvable:$true] %s808_s28 }
  0x29   : > { %v693_v9 = vunpack.c.h.bf16 %v706_v7  ;;  %v692_v11 = vunpack.c.l.bf16 %v706_v7  ;;  %v689_v12 = vunpack.c.h.bf16 %v705_v10  ;;  %v688_v14 = vunpack.c.l.bf16 %v705_v10  ;;  %v702_v19 = vld [vmem:[%s1127_s1 + $0x8] sm:$0xff]   ;;  %v671_v22 = vld [vmem:[%s1127_s1] sm:$0xff]   ;;  %s810_s21 = scalar_lea.hbm %s809_s28, 16  ;;  %p815_p4 = scmp.lt.s32.totalorder %s809_s28, %s1133_s7 }
  0x2a   : > { %368 = vmatpush.msra.mxu0 %v701_v4  ;;  %v685_v15 = vunpack.c.h.bf16 %v704_v13  ;;  %v684_v17 = vunpack.c.l.bf16 %v704_v13  ;;  %v681_v18 = vunpack.c.h.bf16 %v703_v16  ;;  %v680_v20 = vunpack.c.l.bf16 %v703_v16  ;;  %v1049_v26 = vld [vmem:[%s305_s10] sm:$0xff]  ;;  %v1052_v27 = vld [vmem:[%s305_s10 + $0x8] sm:$0xff]  ;;  %p811_p1 = scmp.ne.s32.totalorder %s809_s28, %s810_s21  ;;  %p816_p5 = scmp.lt.s32.totalorder %s814_s23, %s810_s21 }
  0x2b   : > { %v677_v21 = vunpack.c.h.bf16 %v702_v19  ;;  %v676_v23 = vunpack.c.l.bf16 %v702_v19  ;;  %v673_v24 = vunpack.c.h.bf16 %v671_v22  ;;  %v672_v25 = vunpack.c.l.bf16 %v671_v22  ;;  %v394_v28 = vld [vmem:[%s1129_s3] sm:$0xff]  ;;  %v428_v36 = vld [vmem:[%s1131_s5 + $0x8] sm:$0xff] }
  0x2c   : > { %369 = vmatpush.msra.mxu0 %v700_v5  ;;  %397 = vperm.xlu0 %784, %v394_v28   ;;  %v427_v30 = vld [vmem:[%s1131_s5] sm:$0xff]  ;;  %v426_v42 = vld [vmem:[%s1130_s4 + $0x8] sm:$0xff]  ;;  %vm516_vm2 = vcmask 1041408   ;;  %vm509_vm6 = vcmask 15360   ;;  %p812_p2 = pnand %p811_p1, %p994_p8  ;;  %p817_p6 = por %p816_p5, %p815_p4 }
  0x2d   : > { %v393_v35 = vld [vmem:[%s1128_s2] sm:$0xff]  ;;  %436 = vperm.xlu1 %785, %v428_v36  }
  0x2e   : > { %370 = vmatpush.msra.mxu0 %v697_v6  ;;  %v425_v41 = vld [vmem:[%s1130_s4] sm:$0xff]  ;;  %p813_p3 = pneg %p812_p2 }
  0x2f   : > { %v507_v43 = vld [vmem:[%s1132_s6] sm:$0x1] }
  0x30   : > { %371 = vmatpush.msra.mxu0 %v696_v8  ;;  %v508_v44 = vunpack.c.l.bf16 %v507_v43  ;;  %p818_p7 = pnand %p817_p6, %p813_p3 }
  0x32   : > { %372 = vmatpush.msra.mxu0 %v693_v9  ;;  %662 = vmatpush.msk.msra.mxu3 %vm516_vm2, %v508_v44 }
  0x34   : > { %373 = vmatpush.msra.mxu0 %v692_v11  ;;  %431 = vperm.xlu0 %784, %v427_v30  }
  0x36   : > { %374 = vmatpush.msra.mxu0 %v689_v12 }
  0x38   : > { %375 = vmatpush.msra.mxu0 %v688_v14 }
  0x3a   : > { %376 = vmatpush.msra.mxu0 %v685_v15 }
  0x3c   : > { %377 = vmatpush.msra.mxu0 %v684_v17 }
  0x3e   : > { %378 = vmatpush.msra.mxu0 %v681_v18 }
  0x40   : > { %379 = vmatpush.msra.mxu0 %v680_v20 }
  0x42   : > { %380 = vmatpush.msra.mxu0 %v677_v21 }
  0x44   : > { %381 = vmatpush.msra.mxu0 %v676_v23 }
  0x46   : > { %382 = vmatpush.msra.mxu0 %v673_v24 }
  0x48   : > { %383 = vmatpush.msra.mxu0 %v672_v25 }
  0x49   : > { %384 = vmatmul.f32.vlgmr.msra.gmra.mxu0 %v1049_v26 }
  0x51   : > { %387 = vmatmul.f32.gmra.mxu0 %v1052_v27 }
  0x9e   : > { %v398_v37 = vpop.permute.xlu0 %397 }
  0x9f   : > { %v437_v49 = vpop.permute.xlu1 %436 }
  0xa6   : > { %v432_v45 = vpop.permute.xlu0 %431 }
  0xc6   : > { %v385_v31 = vpop.f32.mrf.mxu0 }
  0xc7   : > { %v391_v34 = vmul.f32 0.015625, %v385_v31 }
  0xce   : > { %v388_v32 = vpop.f32.mrf.mxu0 }
  0xcf   : > { %v392_v33 = vmul.f32 0.015625, %v388_v32 }
  0xd1   : > { %418 = vmatpush.msra.mxu1 %v392_v33 }
  0xd3   : > { %419 = vmatpush.msra.mxu1 %v391_v34 }
  0xd4   : > { %657 = vmatmul.msk.f32.vlgmr.msra.gmra.mxu1 %vm400_vm0, %v393_v35 }
 0x151   : > { %v421_v38 = vpop.f32.mrf.mxu1 }
 0x152   : > { %v422_v39 = vadd.f32 %v421_v38, %v398_v37 }
 0x154   : > { %v424_v40 = vmax.f32 %v422_v39, 0.0 }
 0x156   : > { %461 = vmatpush.msra.mxu2 %v424_v40 }
 0x157   : > { %658 = vmatmul.msk.f32.vlgmr.msra.gmra.mxu2 %vm439_vm1, %v425_v41 }
 0x15f   : > { %659 = vmatmul.msk.f32.gmra.mxu2 %vm439_vm1, %v426_v42 }
 0x1da   : > { %v463_v46 = vpop.f32.mrf.mxu2 }
 0x1db   : > { %v464_v47 = vadd.f32 %v463_v46, %v432_v45 }
 0x1dd   : > { %v660_v48 = vmul.f32 -1.442695, %v464_v47 }
 0x1df   : > { %786 = vpow2.f32 %v660_v48 }
 0x1e2   : > { %v466_v50 = vpop.f32.mrf.mxu2 }
 0x1e3   : > { %v467_v51 = vadd.f32 %v466_v50, %v437_v49 }
 0x1e5   : > { %v787_v52 = vpop.eup %786  ;;  %v661_v53 = vmul.f32 -1.442695, %v467_v51 }
 0x1e6   : > { %v475_v54 = vadd.f32 1.0, %v787_v52 }
 0x1e7   : > { %788 = vpow2.f32 %v661_v53 }
 0x1e8   : > { %790 = vrcp.f32 %v475_v54  ;;  %v488_v60 = vand.u32 2147483648, %v475_v54  ;;  %v486_v62 = vand.u32 2147483647, %v475_v54  ;;  %vm482_vm4 = vweird.f32 %v475_v54 }
 0x1ea   : > { %v489_v1 = vor.u32 1.1754944e-38, %v488_v60  ;;  %vm487_vm7 = vcmp.eq.f32.partialorder %v486_v62, 8.507059e+37 }
 0x1ed   : > { %v789_v55 = vpop.eup %788 }
 0x1ee   : > { %v791_v56 = vpop.eup %790  ;;  %v476_v57 = vadd.f32 1.0, %v789_v55 }
 0x1ef   : > { %v478_v58 = vmul.f32 %v791_v56, %v475_v54  ;;  %vm483_vm3 = vweird.f32 %v791_v56 }
 0x1f0   : > { %792 = vrcp.f32 %v476_v57  ;;  %vm484_vm5 = vmor %vm482_vm4, %vm483_vm3  ;;  %v503_v6 = vand.u32 2147483648, %v476_v57  ;;  %v501_v8 = vand.u32 2147483647, %v476_v57  ;;  %vm497_vm9 = vweird.f32 %v476_v57 }
 0x1f1   : > { %v479_v59 = vsub.f32 1.0, %v478_v58 }
 0x1f2   : > { %v504_v10 = vor.u32 1.1754944e-38, %v503_v6  ;;  %vm502_vm11 = vcmp.eq.f32.partialorder %v501_v8, 8.507059e+37 }
 0x1f3   : > { %v480_v61 = vmul.f32 %v791_v56, %v479_v59 }
 0x1f5   : > { %v481_v63 = vadd.f32 %v791_v56, %v480_v61 }
 0x1f6   : > { %v793_v0 = vpop.eup %792 }
 0x1f7   : > { %v485_v2 = vsel %vm484_vm5, %v791_v56, %v481_v63  ;;  %v493_v3 = vmul.f32 %v793_v0, %v476_v57  ;;  %vm498_vm8 = vweird.f32 %v793_v0 }
 0x1f8   : > { %v490_v4 = vsel %vm487_vm7, %v489_v1, %v485_v2  ;;  %vm499_vm10 = vmor %vm497_vm9, %vm498_vm8 }
 0x1f9   : > { %663 = vmatmul.msk.f32.vlgmr.msra.gmra.mxu3 %vm509_vm6, %v490_v4  ;;  %v494_v5 = vsub.f32 1.0, %v493_v3 }
 0x1fb   : > { %v495_v7 = vmul.f32 %v793_v0, %v494_v5 }
 0x1fd   : > { %v496_v9 = vadd.f32 %v793_v0, %v495_v7 }
 0x1ff   : > { %v500_v11 = vsel %vm499_vm10, %v793_v0, %v496_v9 }
 0x200   : > { %v505_v12 = vsel %vm502_vm11, %v504_v10, %v500_v11 }
 0x201   : > { %664 = vmatmul.msk.f32.gmra.mxu3 %vm509_vm6, %v505_v12 }
 0x27c   : > { %v537_v13 = vpop.f32.mrf.mxu3 }
 0x27d   : > { %v543_v14 = vmul.f32 %v537_v13, %v1049_v26 }
 0x27f   : > { %545 = vst [vmem:[%s333_s18] sm:$0xff] %v543_v14 }
 0x284   : > { %v540_v15 = vpop.f32.mrf.mxu3 }
 0x285   : > { %v544_v16 = vmul.f32 %v540_v15, %v1052_v27 }
 0x287   : > { %546 = vst [vmem:[%s333_s18 + $0x8] sm:$0xff] %v544_v16 }
 0x288   : > { %821 = shalt.err (!%p818_p7)
}
 0x289   : > { %s891_s12 = smov 128   ;;  %s892_s17 = smov 256  }
 0x28a   : > { %s893_s18 = smov 8  }
 0x28b   : > { %709 = dma.vmem_to_hbm [thread:$0]  (%p994_p8), %s562_s14, 256, %s564_s19, %s548_s27, %s891_s12, %s892_s17, %s893_s18  }
 0x28c PF: > { %p715_p10 = scmp.ge.s32.totalorder %s888_s8, 2  ;;  %s578_s22 = sand.u32 1, %s860_s24  }
 0x28d   : > { %s579_s28 = scalar_lea.sflag [#allocation4], %s578_s22 }
 0x28e   : > { %p712_p11 = pnand %p715_p10, %p998_p9 }
 0x290   : > { %p713_p12 = pneg %p712_p11 }
 0x292   : > { %855 = dma.done.wait (%p713_p12), %s579_s28, 256  }
 0x293   : > { %857 = vsyncadd (%p713_p12), %s579_s28, 4294967040  ;;  %s20_s8 = sadd.s32 1, %s888_s8   ;;  %s1139_s15 = sld [smem:[#allocation6_spill]] }
 0x294   : > { %p17_p13 = scmp.ge.s32.totalorder %s20_s8, 6   ;;  %s1140_s24 = smov %s864_s25 }
 0x295   : > { %s1141_s25 = smov %s868_s26  ;;  %s1142_s26 = smov %s1006_s20 }
 0x296   : > { %s1143_s27 = smov %s880_s29  ;;  %s1144_s28 = smov %s884_s30 }
 0x297   : > { %s1145_s29 = smov %s1148_s11  ;;  %19 = sbr.rel (!%p17_p13) target bundleno = 5 (0x5), region = 126 }
 0x299   : > { %s1146_s30 = smov %s1139_s15 }
 0x29c   :  { %585 = vsyncpa [#allocation4], 1 }
 0x29d   :  { %587 = vsyncpa [#allocation4 + $0x1], 1 }

</bundles_post_ra>
